<compile_context>
chip_gen: v6e
topology: v6e:2x2x1
jax: 0.10.0
libtpu: 0.0.40
codegen_flags: <defaults>
</compile_context>

<pallas_src>
import jax
import jax.numpy as jnp
from jax import lax
from jax.experimental import pallas as pl
from jax.experimental.pallas import tpu as pltpu
import numpy as np

# ---- model hyperparameters (small, consistent with the module) ----
BATCH          = 2
CONTEXT_LENGTH = 8           # tokens
EMB_DIM        = 32
N_HEADS        = 4
HEAD_DIM       = EMB_DIM // N_HEADS
FF_MULT        = 4
FF_DIM         = EMB_DIM * FF_MULT      # 128 -> exact lane-tile boundary
N_LAYERS       = 2
EPS            = 1e-5
THETA_BASE     = 10000.0
NEG_INF        = -1e30       # large finite negative (robust vs. -inf arithmetic)


# ---------------------------------------------------------------------------
# Fused kernel: grid = (layer,).  The output block (whole batch) stays resident
# in VMEM across the layer axis and carries the activation.
# ---------------------------------------------------------------------------
def transformer_stack_kernel(x_ref, wqkvr_ref, wo_ref, g1_ref, g2_ref,
                             w12_ref, b12_ref, w3_ref, b3_ref,
                             cos2_ref, sin2_ref, hmask_ref, amask_ref, o_ref):
    B, T, D, H = BATCH, CONTEXT_LENGTH, EMB_DIM, N_HEADS
    layer = pl.program_id(0)

    # Seed the resident activation carry at the first layer.
    @pl.when(layer == 0)
    def _():
        o_ref[...] = x_ref[...]

    x = o_ref[...]                       # (B*T, D) f32 carry
    cos2 = cos2_ref[...]                 # (B*T, 2D)  cos table for the [q|k] lanes
    sin2 = sin2_ref[...]                 # (B*T, 2D)  sin table for the [q|k] lanes
    hmask = hmask_ref[...]               # (B*H*T, D) per-head lane mask (0/1)
    amask = amask_ref[...]               # (B*H*T, B*T) causal + cross-batch additive mask

    def rmsnorm(v, g):
        return v * lax.rsqrt(jnp.mean(v * v, axis=-1, keepdims=True) + EPS) * g

    # ---------------- attention sub-block ----------------
    xn = rmsnorm(x, g1_ref[0])
    # fused projection: [ q | k | q@R | k@R | v ]   (R = rotate-half; 1/sqrt(hd) in Wq)
    qkv = jnp.dot(xn, wqkvr_ref[0], preferred_element_type=jnp.float32)   # (B*T, 5D)
    qk_rope = qkv[:, :2 * D] * cos2 + qkv[:, 2 * D:4 * D] * sin2          # RoPE
    q = qk_rope[:, :D]                                                    # (B*T, D)
    k = qk_rope[:, D:]                                                    # (B*T, D)
    v = qkv[:, 4 * D:]                                                    # (B*T, D)

    # Head-expanded, head-masked queries; rows ordered (batch, head, token).
    qexp = jnp.broadcast_to(q.reshape(B, 1, T, D), (B, H, T, D)).reshape(B * H * T, D)
    qexp = qexp * hmask
    s = jnp.einsum('ad,jd->aj', qexp, k,
                   preferred_element_type=jnp.float32) + amask            # (B*H*T, B*T)
    m = jnp.max(s, axis=-1, keepdims=True)
    p = jnp.exp(s - m)
    w = p * pl.reciprocal(jnp.sum(p, axis=-1, keepdims=True), approx=True)
    c = jnp.dot(w, v, preferred_element_type=jnp.float32)                 # (B*H*T, D)
    # Re-pack heads into lanes: select each row's head lanes, sum over the head axis.
    ctx = jnp.sum((c * hmask).reshape(B, H, T, D), axis=1).reshape(B * T, D)
    x = x + jnp.dot(ctx, wo_ref[0], preferred_element_type=jnp.float32)   # single DxD proj

    # ---------------- feed-forward sub-block (SwiGLU) ----------------
    xn2 = rmsnorm(x, g2_ref[0])
    h12 = jnp.dot(xn2, w12_ref[0], preferred_element_type=jnp.float32) + b12_ref[0]
    h1 = h12[:, :FF_DIM]                 # split at the 128-lane tile boundary (free)
    h2 = h12[:, FF_DIM:]
    hs = (h1 * jax.nn.sigmoid(h1)) * h2  # silu(h1) * h2
    ff = jnp.dot(hs, w3_ref[0], preferred_element_type=jnp.float32) + b3_ref[0]

    o_ref[...] = (x + ff).astype(o_ref.dtype)


# ---------------------------------------------------------------------------
# Wrapper: single pallas_call for the whole layer stack, batch folded into block.
# ---------------------------------------------------------------------------
def transformer_stack(x, stacked, consts):
    B, T, D = x.shape
    L = stacked['wqkvr'].shape[0]
    x_flat = x.reshape(B * T, D)

    def layer_w(arr):     # per-layer stacked weight, selected by the layer axis
        shape = arr.shape[1:]
        n = len(shape)
        return pl.BlockSpec((1,) + shape, lambda l, n=n: (l,) + (0,) * n)

    def const(arr):       # layer-invariant table (DMA'd once)
        n = arr.ndim
        return pl.BlockSpec(arr.shape, lambda l, n=n: (0,) * n)

    weights = [stacked[k] for k in
               ('wqkvr', 'wo', 'g1', 'g2', 'w12', 'b12', 'w3', 'b3')]
    tables = [consts[k] for k in ('cos2', 'sin2', 'hmask', 'amask')]

    in_specs = ([pl.BlockSpec((B * T, D), lambda l: (0, 0))]       # x (read at layer 0)
                + [layer_w(wgt) for wgt in weights]
                + [const(t) for t in tables])

    out = pl.pallas_call(
        transformer_stack_kernel,
        out_shape=jax.ShapeDtypeStruct((B * T, D), x.dtype),
        grid_spec=pltpu.PrefetchScalarGridSpec(
            num_scalar_prefetch=0,
            grid=(L,),                                # layers only; batch folded in block
            in_specs=in_specs,
            out_specs=pl.BlockSpec((B * T, D), lambda l: (0, 0)),
        ),
        compiler_params=pltpu.CompilerParams(
            dimension_semantics=("arbitrary",),       # carry across layers
            vmem_limit_bytes=32 * 1024 * 1024),
    )(x_flat, *weights, *tables)
    return out.reshape(B, T, D)


# ---------------------------------------------------------------------------
# RoPE angle precompute (matches SelfAttention.compute_rope_angles) + constants
# ---------------------------------------------------------------------------
def compute_rope_angles(head_dim, theta_base, context_length):
    freqs = theta_base ** (-2.0 * (jnp.arange(0, head_dim // 2, dtype=jnp.float32) / head_dim))
    positions = jnp.arange(context_length, dtype=jnp.float32)[:, None]
    angles = positions * freqs[None, :]
    angles = jnp.concatenate([angles, angles], axis=1)     # (T, head_dim)
    return jnp.cos(angles), jnp.sin(angles)


def rotate_half_matrix():
    """(D, D) block-diagonal matrix R such that (t @ R) == rotate_half(t) per head."""
    hd, half = HEAD_DIM, HEAD_DIM // 2
    blk = np.zeros((hd, hd), np.float32)
    for j in range(half):
        blk[j + half, j] = -1.0      # lower-half output lanes get -rhs
        blk[j, j + half] = 1.0       # upper-half output lanes get +lhs
    return jnp.asarray(np.kron(np.eye(N_HEADS, dtype=np.float32), blk))


def make_const_tables(cos, sin):
    """RoPE tables for the fused [q|k] lanes, per-head lane mask, attention mask."""
    B, T, D, H, hd = BATCH, CONTEXT_LENGTH, EMB_DIM, N_HEADS, HEAD_DIM
    cos_d = jnp.tile(cos, (1, H))                                        # (T, D)
    sin_d = jnp.tile(sin, (1, H))
    cos2 = jnp.tile(jnp.concatenate([cos_d, cos_d], axis=1), (B, 1))     # (B*T, 2D)
    sin2 = jnp.tile(jnp.concatenate([sin_d, sin_d], axis=1), (B, 1))

    a = np.arange(B * H * T)                 # expanded-row index, ordered (b, h, t)
    b_of_a = a // (H * T)
    h_of_a = (a // T) % H
    t_of_a = a % T
    d = np.arange(D)
    hmask = (d[None, :] // hd == h_of_a[:, None]).astype(np.float32)     # (B*H*T, D)

    j = np.arange(B * T)                     # key-row index, ordered (b, s)
    ok = (j[None, :] // T == b_of_a[:, None]) & (j[None, :] % T <= t_of_a[:, None])
    amask = np.where(ok, 0.0, NEG_INF).astype(np.float32)                # (B*H*T, B*T)

    return dict(cos2=cos2, sin2=sin2,
                hmask=jnp.asarray(hmask), amask=jnp.asarray(amask))


def stack_layer_params(layer_params):
    """Fuse per-layer weights (QKV + rotate-half images, W1|W2) and stack over layers."""
    R = rotate_half_matrix()
    scale = 1.0 / (HEAD_DIM ** 0.5)

    def fuse(p):
        wq = p['wq'] * scale       # fold 1/sqrt(head_dim) into Wq (RoPE is linear -> OK)
        return dict(
            wqkvr=jnp.concatenate([wq, p['wk'], wq @ R, p['wk'] @ R, p['wv']], axis=1),
            wo=p['wo'],
            g1=p['g1'], g2=p['g2'],
            w12=jnp.concatenate([p['w1'], p['w2']], axis=1),
            b12=jnp.concatenate([p['b1'], p['b2']], axis=1),
            w3=p['w3'], b3=p['b3'],
        )

    fused = [fuse(p) for p in layer_params]
    return {k: jnp.stack([f[k] for f in fused], axis=0) for k in fused[0]}


# ---------------------------------------------------------------------------
# Deterministic parameter init (shapes implied by the module __init__)
# ---------------------------------------------------------------------------
def init_layer_params(key):
    ks = jax.random.split(key, 9)
    s = 0.05
    return dict(
        wq=jax.random.normal(ks[0], (EMB_DIM, EMB_DIM), jnp.float32) * s,
        wk=jax.random.normal(ks[1], (EMB_DIM, EMB_DIM), jnp.float32) * s,
        wv=jax.random.normal(ks[2], (EMB_DIM, EMB_DIM), jnp.float32) * s,
        wo=jax.random.normal(ks[3], (EMB_DIM, EMB_DIM), jnp.float32) * s,
        g1=jnp.ones((1, EMB_DIM), jnp.float32),
        g2=jnp.ones((1, EMB_DIM), jnp.float32),
        w1=jax.random.normal(ks[4], (EMB_DIM, FF_DIM), jnp.float32) * s,
        b1=jax.random.normal(ks[5], (1, FF_DIM), jnp.float32) * s,
        w2=jax.random.normal(ks[6], (EMB_DIM, FF_DIM), jnp.float32) * s,
        b2=jax.random.normal(ks[7], (1, FF_DIM), jnp.float32) * s,
        w3=jax.random.normal(ks[8], (FF_DIM, EMB_DIM), jnp.float32) * s,
        b3=jnp.zeros((1, EMB_DIM), jnp.float32),
    )


# ---------------------------------------------------------------------------
# Pure-JAX reference (mirrors the PyTorch forward exactly)
# ---------------------------------------------------------------------------
def ref_layer(x, p, cos, sin):
    B, T, D = x.shape

    def rmsnorm(v, g):
        rms = jnp.sqrt(jnp.mean(v * v, -1, keepdims=True) + EPS)
        return v / rms * g

    xn = rmsnorm(x, p['g1'][0])
    q, k, v = xn @ p['wq'], xn @ p['wk'], xn @ p['wv']

    def split(t):
        return t.reshape(B, T, N_HEADS, HEAD_DIM).transpose(0, 2, 1, 3)

    qs, ks, vs = split(q), split(k), split(v)

    def rope(t):
        l, r = t[..., :HEAD_DIM // 2], t[..., HEAD_DIM // 2:]
        rot = jnp.concatenate([-r, l], axis=-1)
        return t * cos[None, None] + rot * sin[None, None]

    qs, ks = rope(qs), rope(ks)
    s = jnp.einsum('bhtd,bhsd->bhts', qs, ks) / HEAD_DIM ** 0.5
    mask = jnp.triu(jnp.ones((T, T), bool), 1)
    s = jnp.where(mask[None, None], -jnp.inf, s)
    w = jax.nn.softmax(s, axis=-1)
    ctx = jnp.einsum('bhts,bhsd->bhtd', w, vs).transpose(0, 2, 1, 3).reshape(B, T, D)
    x = x + ctx @ p['wo']

    xn2 = rmsnorm(x, p['g2'][0])
    h1 = xn2 @ p['w1'] + p['b1'][0]
    h2 = xn2 @ p['w2'] + p['b2'][0]
    return x + (jax.nn.silu(h1) * h2) @ p['w3'] + p['b3'][0]


def ref_stack(x, layer_params, cos, sin):
    for p in layer_params:
        x = ref_layer(x, p, cos, sin)
    return x


if __name__ == "__main__":
    key = jax.random.PRNGKey(0)
    kx, *klayers = jax.random.split(key, N_LAYERS + 1)

    x = jax.random.normal(kx, (BATCH, CONTEXT_LENGTH, EMB_DIM), jnp.float32)
    cos, sin = compute_rope_angles(HEAD_DIM, THETA_BASE, CONTEXT_LENGTH)
    layer_params = [init_layer_params(k) for k in klayers]

    stacked = stack_layer_params(layer_params)
    consts = make_const_tables(cos, sin)

    out = jax.block_until_ready(transformer_stack(x, stacked, consts))
    ref = jax.block_until_ready(ref_stack(x, layer_params, cos, sin))

    # Tolerance loosened slightly for pl.reciprocal(approx=True) in the softmax denom.
    np.testing.assert_allclose(np.asarray(out), np.asarray(ref), rtol=2e-3, atol=2e-3)

    print("KERNEL_OK")
</pallas_src>

<mosaic_0001>
module attributes {stable_mosaic.version = 11 : i64} {
  func.func @transformer_stack_kernel(%arg0: i32, %arg1: memref<16x32xf32, #tpu.memory_space<vmem>>, %arg2: memref<1x32x160xf32, #tpu.memory_space<vmem>>, %arg3: memref<1x32x32xf32, #tpu.memory_space<vmem>>, %arg4: memref<1x1x32xf32, #tpu.memory_space<vmem>>, %arg5: memref<1x1x32xf32, #tpu.memory_space<vmem>>, %arg6: memref<1x32x256xf32, #tpu.memory_space<vmem>>, %arg7: memref<1x1x256xf32, #tpu.memory_space<vmem>>, %arg8: memref<1x128x32xf32, #tpu.memory_space<vmem>>, %arg9: memref<1x1x32xf32, #tpu.memory_space<vmem>>, %arg10: memref<16x64xf32, #tpu.memory_space<vmem>>, %arg11: memref<16x64xf32, #tpu.memory_space<vmem>>, %arg12: memref<64x32xf32, #tpu.memory_space<vmem>>, %arg13: memref<64x16xf32, #tpu.memory_space<vmem>>, %arg14: memref<16x32xf32, #tpu.memory_space<vmem>>) attributes {dimension_semantics = [#tpu.dimension_semantics<arbitrary>], iteration_bounds = array<i64: 2>, scalar_prefetch = 0 : i64, scratch_operands = 0 : i64, tpu.core_type = #tpu.core_type<tc>, window_params = [{pipeline_mode = #tpu.pipeline_mode<synchronous>, transform_indices = @transform_0, window_bounds = array<i64: 16, 32>}, {transform_indices = @transform_1, window_bounds = array<i64: 1, 32, 160>}, {transform_indices = @transform_2, window_bounds = array<i64: 1, 32, 32>}, {transform_indices = @transform_3, window_bounds = array<i64: 1, 1, 32>}, {transform_indices = @transform_4, window_bounds = array<i64: 1, 1, 32>}, {transform_indices = @transform_5, window_bounds = array<i64: 1, 32, 256>}, {transform_indices = @transform_6, window_bounds = array<i64: 1, 1, 256>}, {transform_indices = @transform_7, window_bounds = array<i64: 1, 128, 32>}, {transform_indices = @transform_8, window_bounds = array<i64: 1, 1, 32>}, {pipeline_mode = #tpu.pipeline_mode<synchronous>, transform_indices = @transform_9, window_bounds = array<i64: 16, 64>}, {pipeline_mode = #tpu.pipeline_mode<synchronous>, transform_indices = @transform_10, window_bounds = array<i64: 16, 64>}, {pipeline_mode = #tpu.pipeline_mode<synchronous>, transform_indices = @transform_11, window_bounds = array<i64: 64, 32>}, {pipeline_mode = #tpu.pipeline_mode<synchronous>, transform_indices = @transform_12, window_bounds = array<i64: 64, 16>}, {pipeline_mode = #tpu.pipeline_mode<synchronous>, transform_indices = @transform_13, window_bounds = array<i64: 16, 32>}]} {
    %c0_i32 = arith.constant 0 : i32
    %0 = arith.cmpi eq, %arg0, %c0_i32 : i32
    %1 = arith.extui %0 : i1 to i32
    %c0_i32_0 = arith.constant 0 : i32
    %2 = arith.cmpi ne, %1, %c0_i32_0 : i32
    scf.if %2 {
      %c0_51 = arith.constant 0 : index
      %c0_52 = arith.constant 0 : index
      %98 = vector.load %arg1[%c0_51, %c0_52] : memref<16x32xf32, #tpu.memory_space<vmem>>, vector<16x32xf32>
      %c0_53 = arith.constant 0 : index
      %c0_54 = arith.constant 0 : index
      %99 = vector.load %arg14[%c0_53, %c0_54] : memref<16x32xf32, #tpu.memory_space<vmem>>, vector<16x32xf32>
      tpu.vector_store %arg14[%c0_53, %c0_54], %98 {strides = array<i32>} : memref<16x32xf32, #tpu.memory_space<vmem>>, vector<16x32xf32>,
    } else {
    }
    %c0 = arith.constant 0 : index
    %c0_1 = arith.constant 0 : index
    %3 = vector.load %arg14[%c0, %c0_1] : memref<16x32xf32, #tpu.memory_space<vmem>>, vector<16x32xf32>
    %c0_2 = arith.constant 0 : index
    %c0_3 = arith.constant 0 : index
    %4 = vector.load %arg10[%c0_2, %c0_3] : memref<16x64xf32, #tpu.memory_space<vmem>>, vector<16x64xf32>
    %c0_4 = arith.constant 0 : index
    %c0_5 = arith.constant 0 : index
    %5 = vector.load %arg11[%c0_4, %c0_5] : memref<16x64xf32, #tpu.memory_space<vmem>>, vector<16x64xf32>
    %c0_6 = arith.constant 0 : index
    %c0_7 = arith.constant 0 : index
    %6 = vector.load %arg12[%c0_6, %c0_7] : memref<64x32xf32, #tpu.memory_space<vmem>>, vector<64x32xf32>
    %c0_8 = arith.constant 0 : index
    %c0_9 = arith.constant 0 : index
    %7 = vector.load %arg13[%c0_8, %c0_9] : memref<64x16xf32, #tpu.memory_space<vmem>>, vector<64x16xf32>
    %c0_10 = arith.constant 0 : index
    %c0_11 = arith.constant 0 : index
    %c0_12 = arith.constant 0 : index
    %8 = vector.load %arg4[%c0_10, %c0_11, %c0_12] : memref<1x1x32xf32, #tpu.memory_space<vmem>>, vector<1x1x32xf32>
    %9 = vector.shape_cast %8 : vector<1x1x32xf32> to vector<1x32xf32>
    %10 = arith.mulf %3, %3 : vector<16x32xf32>
    %cst = arith.constant dense<0.000000e+00> : vector<16xf32>
    %11 = vector.multi_reduction <add>, %10, %cst [1] : vector<16x32xf32> to vector<16xf32>
    %12 = vector.shape_cast %11 : vector<16xf32> to vector<16x1xf32>
    %cst_13 = arith.constant 3.200000e+01 : f32
    %13 = vector.broadcast %cst_13 : f32 to vector<16x1xf32>
    %14 = arith.divf %12, %13 : vector<16x1xf32>
    %cst_14 = arith.constant 9.99999974E-6 : f32
    %15 = vector.broadcast %cst_14 : f32 to vector<16x1xf32>
    %16 = arith.addf %14, %15 : vector<16x1xf32>
    %17 = math.rsqrt %16 : vector<16x1xf32>
    %18 = vector.broadcast %17 : vector<16x1xf32> to vector<16x32xf32>
    %19 = arith.mulf %3, %18 : vector<16x32xf32>
    %20 = vector.broadcast %9 : vector<1x32xf32> to vector<16x32xf32>
    %21 = arith.mulf %19, %20 : vector<16x32xf32>
    %c0_15 = arith.constant 0 : index
    %c0_16 = arith.constant 0 : index
    %c0_17 = arith.constant 0 : index
    %22 = vector.load %arg2[%c0_15, %c0_16, %c0_17] : memref<1x32x160xf32, #tpu.memory_space<vmem>>, vector<1x32x160xf32>
    %23 = vector.shape_cast %22 : vector<1x32x160xf32> to vector<32x160xf32>
    %cst_18 = arith.constant dense<0.000000e+00> : vector<16x160xf32>
    %24 = tpu.matmul %21, %23, %cst_18 {dimension_numbers = #tpu.dot_dimension_numbers<[1], [0], [0], [1], [0, 0, 1, 1], [], []>} : vector<16x32xf32>, vector<32x160xf32>, vector<16x160xf32> -> vector<16x160xf32>
    %25 = vector.extract_strided_slice %24 {offsets = [0, 0], sizes = [16, 64], strides = [1, 1]} : vector<16x160xf32> to vector<16x64xf32>
    %26 = arith.mulf %25, %4 : vector<16x64xf32>
    %27 = vector.extract_strided_slice %24 {offsets = [0, 64], sizes = [16, 64], strides = [1, 1]} : vector<16x160xf32> to vector<16x64xf32>
    %28 = arith.mulf %27, %5 : vector<16x64xf32>
    %29 = arith.addf %26, %28 : vector<16x64xf32>
    %30 = vector.extract_strided_slice %29 {offsets = [0, 0], sizes = [16, 32], strides = [1, 1]} : vector<16x64xf32> to vector<16x32xf32>
    %31 = vector.extract_strided_slice %29 {offsets = [0, 32], sizes = [16, 32], strides = [1, 1]} : vector<16x64xf32> to vector<16x32xf32>
    %32 = vector.extract_strided_slice %24 {offsets = [0, 128], sizes = [16, 32], strides = [1, 1]} : vector<16x160xf32> to vector<16x32xf32>
    %33 = vector.shape_cast %30 : vector<16x32xf32> to vector<2x1x8x32xf32>
    %34 = vector.shape_cast %33 : vector<2x1x8x32xf32> to vector<2x1x8x32xf32>
    %35 = vector.broadcast %34 : vector<2x1x8x32xf32> to vector<2x4x8x32xf32>
    %36 = vector.shape_cast %35 : vector<2x4x8x32xf32> to vector<64x32xf32>
    %37 = arith.mulf %36, %6 : vector<64x32xf32>
    "tpu.trace_start"() <{level = 10 : i32, message = "ad,jd->aj"}> : () -> ()
    %cst_19 = arith.constant dense<0.000000e+00> : vector<64x16xf32>
    %38 = tpu.matmul %37, %31, %cst_19 {dimension_numbers = #tpu.dot_dimension_numbers<[1], [1], [0], [0], [0, 0, 1, 0], [], []>} : vector<64x32xf32>, vector<16x32xf32>, vector<64x16xf32> -> vector<64x16xf32>
    "tpu.trace_stop"() : () -> ()
    %39 = arith.addf %38, %7 : vector<64x16xf32>
    %cst_20 = arith.constant dense<0xFF800000> : vector<64xf32>
    %40 = vector.multi_reduction <maximumf>, %39, %cst_20 [1] : vector<64x16xf32> to vector<64xf32>
    %41 = vector.shape_cast %40 : vector<64xf32> to vector<64x1xf32>
    %42 = vector.broadcast %41 : vector<64x1xf32> to vector<64x16xf32>
    %43 = arith.subf %39, %42 : vector<64x16xf32>
    %44 = math.exp %43 : vector<64x16xf32>
    %cst_21 = arith.constant dense<0.000000e+00> : vector<64xf32>
    %45 = vector.multi_reduction <add>, %44, %cst_21 [1] : vector<64x16xf32> to vector<64xf32>
    %46 = vector.shape_cast %45 : vector<64xf32> to vector<64x1xf32>
    %47 = tpu.reciprocal %46 {approx = true} : vector<64x1xf32> -> vector<64x1xf32>
    %48 = vector.broadcast %47 : vector<64x1xf32> to vector<64x16xf32>
    %49 = arith.mulf %44, %48 : vector<64x16xf32>
    %cst_22 = arith.constant dense<0.000000e+00> : vector<64x32xf32>
    %50 = tpu.matmul %49, %32, %cst_22 {dimension_numbers = #tpu.dot_dimension_numbers<[1], [0], [0], [1], [0, 0, 1, 1], [], []>} : vector<64x16xf32>, vector<16x32xf32>, vector<64x32xf32> -> vector<64x32xf32>
    %51 = arith.mulf %50, %6 : vector<64x32xf32>
    %52 = vector.shape_cast %51 : vector<64x32xf32> to vector<2x4x8x32xf32>
    %cst_23 = arith.constant dense<0.000000e+00> : vector<2x8x32xf32>
    %53 = vector.multi_reduction <add>, %52, %cst_23 [1] : vector<2x4x8x32xf32> to vector<2x8x32xf32>
    %54 = vector.shape_cast %53 : vector<2x8x32xf32> to vector<16x32xf32>
    %c0_24 = arith.constant 0 : index
    %c0_25 = arith.constant 0 : index
    %c0_26 = arith.constant 0 : index
    %55 = vector.load %arg3[%c0_24, %c0_25, %c0_26] : memref<1x32x32xf32, #tpu.memory_space<vmem>>, vector<1x32x32xf32>
    %56 = vector.shape_cast %55 : vector<1x32x32xf32> to vector<32x32xf32>
    %cst_27 = arith.constant dense<0.000000e+00> : vector<16x32xf32>
    %57 = tpu.matmul %54, %56, %cst_27 {dimension_numbers = #tpu.dot_dimension_numbers<[1], [0], [0], [1], [0, 0, 1, 1], [], []>} : vector<16x32xf32>, vector<32x32xf32>, vector<16x32xf32> -> vector<16x32xf32>
    %58 = arith.addf %3, %57 : vector<16x32xf32>
    %c0_28 = arith.constant 0 : index
    %c0_29 = arith.constant 0 : index
    %c0_30 = arith.constant 0 : index
    %59 = vector.load %arg5[%c0_28, %c0_29, %c0_30] : memref<1x1x32xf32, #tpu.memory_space<vmem>>, vector<1x1x32xf32>
    %60 = vector.shape_cast %59 : vector<1x1x32xf32> to vector<1x32xf32>
    %61 = arith.mulf %58, %58 : vector<16x32xf32>
    %cst_31 = arith.constant dense<0.000000e+00> : vector<16xf32>
    %62 = vector.multi_reduction <add>, %61, %cst_31 [1] : vector<16x32xf32> to vector<16xf32>
    %63 = vector.shape_cast %62 : vector<16xf32> to vector<16x1xf32>
    %cst_32 = arith.constant 3.200000e+01 : f32
    %64 = vector.broadcast %cst_32 : f32 to vector<16x1xf32>
    %65 = arith.divf %63, %64 : vector<16x1xf32>
    %cst_33 = arith.constant 9.99999974E-6 : f32
    %66 = vector.broadcast %cst_33 : f32 to vector<16x1xf32>
    %67 = arith.addf %65, %66 : vector<16x1xf32>
    %68 = math.rsqrt %67 : vector<16x1xf32>
    %69 = vector.broadcast %68 : vector<16x1xf32> to vector<16x32xf32>
    %70 = arith.mulf %58, %69 : vector<16x32xf32>
    %71 = vector.broadcast %60 : vector<1x32xf32> to vector<16x32xf32>
    %72 = arith.mulf %70, %71 : vector<16x32xf32>
    %c0_34 = arith.constant 0 : index
    %c0_35 = arith.constant 0 : index
    %c0_36 = arith.constant 0 : index
    %73 = vector.load %arg6[%c0_34, %c0_35, %c0_36] : memref<1x32x256xf32, #tpu.memory_space<vmem>>, vector<1x32x256xf32>
    %74 = vector.shape_cast %73 : vector<1x32x256xf32> to vector<32x256xf32>
    %cst_37 = arith.constant dense<0.000000e+00> : vector<16x256xf32>
    %75 = tpu.matmul %72, %74, %cst_37 {dimension_numbers = #tpu.dot_dimension_numbers<[1], [0], [0], [1], [0, 0, 1, 1], [], []>} : vector<16x32xf32>, vector<32x256xf32>, vector<16x256xf32> -> vector<16x256xf32>
    %c0_38 = arith.constant 0 : index
    %c0_39 = arith.constant 0 : index
    %c0_40 = arith.constant 0 : index
    %76 = vector.load %arg7[%c0_38, %c0_39, %c0_40] : memref<1x1x256xf32, #tpu.memory_space<vmem>>, vector<1x1x256xf32>
    %77 = vector.shape_cast %76 : vector<1x1x256xf32> to vector<1x256xf32>
    %78 = vector.broadcast %77 : vector<1x256xf32> to vector<16x256xf32>
    %79 = arith.addf %75, %78 : vector<16x256xf32>
    %80 = vector.extract_strided_slice %79 {offsets = [0, 0], sizes = [16, 128], strides = [1, 1]} : vector<16x256xf32> to vector<16x128xf32>
    %81 = vector.extract_strided_slice %79 {offsets = [0, 128], sizes = [16, 128], strides = [1, 1]} : vector<16x256xf32> to vector<16x128xf32>
    %82 = arith.negf %80 : vector<16x128xf32>
    %83 = math.exp %82 : vector<16x128xf32>
    %cst_41 = arith.constant 1.000000e+00 : f32
    %84 = vector.broadcast %cst_41 : f32 to vector<16x128xf32>
    %85 = arith.addf %84, %83 : vector<16x128xf32>
    %86 = arith.divf %84, %85 : vector<16x128xf32>
    %87 = arith.mulf %80, %86 : vector<16x128xf32>
    %88 = arith.mulf %87, %81 : vector<16x128xf32>
    %c0_42 = arith.constant 0 : index
    %c0_43 = arith.constant 0 : index
    %c0_44 = arith.constant 0 : index
    %89 = vector.load %arg8[%c0_42, %c0_43, %c0_44] : memref<1x128x32xf32, #tpu.memory_space<vmem>>, vector<1x128x32xf32>
    %90 = vector.shape_cast %89 : vector<1x128x32xf32> to vector<128x32xf32>
    %cst_45 = arith.constant dense<0.000000e+00> : vector<16x32xf32>
    %91 = tpu.matmul %88, %90, %cst_45 {dimension_numbers = #tpu.dot_dimension_numbers<[1], [0], [0], [1], [0, 0, 1, 1], [], []>} : vector<16x128xf32>, vector<128x32xf32>, vector<16x32xf32> -> vector<16x32xf32>
    %c0_46 = arith.constant 0 : index
    %c0_47 = arith.constant 0 : index
    %c0_48 = arith.constant 0 : index
    %92 = vector.load %arg9[%c0_46, %c0_47, %c0_48] : memref<1x1x32xf32, #tpu.memory_space<vmem>>, vector<1x1x32xf32>
    %93 = vector.shape_cast %92 : vector<1x1x32xf32> to vector<1x32xf32>
    %94 = vector.broadcast %93 : vector<1x32xf32> to vector<16x32xf32>
    %95 = arith.addf %91, %94 : vector<16x32xf32>
    %96 = arith.addf %58, %95 : vector<16x32xf32>
    %c0_49 = arith.constant 0 : index
    %c0_50 = arith.constant 0 : index
    %97 = vector.load %arg14[%c0_49, %c0_50] : memref<16x32xf32, #tpu.memory_space<vmem>>, vector<16x32xf32>
    tpu.vector_store %arg14[%c0_49, %c0_50], %96 {strides = array<i32>} : memref<16x32xf32, #tpu.memory_space<vmem>>, vector<16x32xf32>,
    return
  }
  func.func @transform_0(%arg0: i32) -> (i32, i32) {
    %c0_i32 = arith.constant 0 : i32
    %c0_i32_0 = arith.constant 0 : i32
    %c0_i32_1 = arith.constant 0 : i32
    return %c0_i32, %c0_i32_0 : i32, i32
  }
  func.func @transform_1(%arg0: i32) -> (i32, i32, i32) {
    %c0_i32 = arith.constant 0 : i32
    %c0_i32_0 = arith.constant 0 : i32
    %c0_i32_1 = arith.constant 0 : i32
    return %arg0, %c0_i32, %c0_i32_0 : i32, i32, i32
  }
  func.func @transform_2(%arg0: i32) -> (i32, i32, i32) {
    %c0_i32 = arith.constant 0 : i32
    %c0_i32_0 = arith.constant 0 : i32
    %c0_i32_1 = arith.constant 0 : i32
    return %arg0, %c0_i32, %c0_i32_0 : i32, i32, i32
  }
  func.func @transform_3(%arg0: i32) -> (i32, i32, i32) {
    %c0_i32 = arith.constant 0 : i32
    %c0_i32_0 = arith.constant 0 : i32
    %c0_i32_1 = arith.constant 0 : i32
    return %arg0, %c0_i32, %c0_i32_0 : i32, i32, i32
  }
  func.func @transform_4(%arg0: i32) -> (i32, i32, i32) {
    %c0_i32 = arith.constant 0 : i32
    %c0_i32_0 = arith.constant 0 : i32
    %c0_i32_1 = arith.constant 0 : i32
    return %arg0, %c0_i32, %c0_i32_0 : i32, i32, i32
  }
  func.func @transform_5(%arg0: i32) -> (i32, i32, i32) {
    %c0_i32 = arith.constant 0 : i32
    %c0_i32_0 = arith.constant 0 : i32
    %c0_i32_1 = arith.constant 0 : i32
    return %arg0, %c0_i32, %c0_i32_0 : i32, i32, i32
  }
  func.func @transform_6(%arg0: i32) -> (i32, i32, i32) {
    %c0_i32 = arith.constant 0 : i32
    %c0_i32_0 = arith.constant 0 : i32
    %c0_i32_1 = arith.constant 0 : i32
    return %arg0, %c0_i32, %c0_i32_0 : i32, i32, i32
  }
  func.func @transform_7(%arg0: i32) -> (i32, i32, i32) {
    %c0_i32 = arith.constant 0 : i32
    %c0_i32_0 = arith.constant 0 : i32
    %c0_i32_1 = arith.constant 0 : i32
    return %arg0, %c0_i32, %c0_i32_0 : i32, i32, i32
  }
  func.func @transform_8(%arg0: i32) -> (i32, i32, i32) {
    %c0_i32 = arith.constant 0 : i32
    %c0_i32_0 = arith.constant 0 : i32
    %c0_i32_1 = arith.constant 0 : i32
    return %arg0, %c0_i32, %c0_i32_0 : i32, i32, i32
  }
  func.func @transform_9(%arg0: i32) -> (i32, i32) {
    %c0_i32 = arith.constant 0 : i32
    %c0_i32_0 = arith.constant 0 : i32
    %c0_i32_1 = arith.constant 0 : i32
    return %c0_i32, %c0_i32_0 : i32, i32
  }
  func.func @transform_10(%arg0: i32) -> (i32, i32) {
    %c0_i32 = arith.constant 0 : i32
    %c0_i32_0 = arith.constant 0 : i32
    %c0_i32_1 = arith.constant 0 : i32
    return %c0_i32, %c0_i32_0 : i32, i32
  }
  func.func @transform_11(%arg0: i32) -> (i32, i32) {
    %c0_i32 = arith.constant 0 : i32
    %c0_i32_0 = arith.constant 0 : i32
    %c0_i32_1 = arith.constant 0 : i32
    return %c0_i32, %c0_i32_0 : i32, i32
  }
  func.func @transform_12(%arg0: i32) -> (i32, i32) {
    %c0_i32 = arith.constant 0 : i32
    %c0_i32_0 = arith.constant 0 : i32
    %c0_i32_1 = arith.constant 0 : i32
    return %c0_i32, %c0_i32_0 : i32, i32
  }
  func.func @transform_13(%arg0: i32) -> (i32, i32) {
    %c0_i32 = arith.constant 0 : i32
    %c0_i32_0 = arith.constant 0 : i32
    %c0_i32_1 = arith.constant 0 : i32
    return %c0_i32, %c0_i32_0 : i32, i32
  }
}

</mosaic_0001>

<bundles_post_ra>
// kernel: tpu_custom_call.1
= control target key start
LH: loop header
LB: loop body
LE: loop exit
PB: predicated region body
PF: predicated region fallthrough
CT: control target
= control target key end

     0   :  { %s2222_s0 = inlined_call_operand.vmem [shape: f32[16,32], index: 0, kind: input, shape index: {}]   ;;  %s2223_s1 = inlined_call_operand.vmem [shape: f32[2,32,160], index: 1, kind: input, shape index: {}]   ;;  %s2224_s2 = inlined_call_operand.vmem [shape: f32[2,32,32], index: 2, kind: input, shape index: {}]   ;;  %s2225_s3 = inlined_call_operand.vmem [shape: f32[2,1,32], index: 3, kind: input, shape index: {}]   ;;  %s2226_s4 = inlined_call_operand.vmem [shape: f32[2,1,32], index: 4, kind: input, shape index: {}]   ;;  %s2227_s5 = inlined_call_operand.vmem [shape: f32[2,32,256], index: 5, kind: input, shape index: {}]   ;;  %s2228_s6 = inlined_call_operand.vmem [shape: f32[2,1,256], index: 6, kind: input, shape index: {}]   ;;  %s2229_s7 = inlined_call_operand.vmem [shape: f32[2,128,32], index: 7, kind: input, shape index: {}]   ;;  %s2230_s8 = inlined_call_operand.vmem [shape: f32[2,1,32], index: 8, kind: input, shape index: {}]   ;;  %s2231_s9 = inlined_call_operand.vmem [shape: f32[16,64], index: 9, kind: input, shape index: {}]   ;;  %s2232_s10 = inlined_call_operand.vmem [shape: f32[16,64], index: 10, kind: input, shape index: {}]   ;;  %s2233_s11 = inlined_call_operand.vmem [shape: f32[64,32], index: 11, kind: input, shape index: {}]   ;;  %s2234_s12 = inlined_call_operand.vmem [shape: f32[64,16], index: 12, kind: input, shape index: {}]   ;;  %s2235_s13 = inlined_call_operand.hbm [shape: f32[16,32], index: 13, kind: output, shape index: {}]  }
   0x1   :  { %2238 = sst [smem:[#allocation6_spill]] %s2223_s1 }
   0x2   :  { %2239 = sst [smem:[#allocation7_spill]] %s2224_s2 }
   0x3   :  { %2240 = sst [smem:[#allocation8_spill]] %s2234_s12 }
   0x4   :  { %2241 = sst [smem:[#allocation9_spill]] %s2235_s13 }
   0x5   :  { %18 = vsyncpa [#allocation3], 0  ;;  %s1913_s25 = smov 0  }
   0x6 LB: > { %2242 = sst [smem:[#allocation5_spill]] %s1835_s25  ;;  %s1919_s26 = sadd.s32 4294967295, %s1835_s25   ;;  %s1835_s25 = sphi %s1913_s25, %s24_s25  }
   0x7   : > { %p1563_p0 = scmp.ge.s32.totalorder %s1835_s25, 1  ;;  %p446_p1 = scmp.lt.s32.totalorder %s1835_s25, 3 }
   0x9   : > { %p447_p2 = pnand %p1563_p0, %p446_p1 }
   0xa   : > { %p513_p3 = scmp.lt.s32.totalorder (!%p447_p2), %s1919_s26, 1  ;;  %s2243_s1 = sld [smem:[#allocation6_spill]] (!%p447_p2) }
   0xb   : > { %450 = sbr.rel (%p447_p2) target bundleno = 2173 (0x87d), region = 72  ;;  %s2244_s2 = sld [smem:[#allocation7_spill]] (!%p447_p2) }
   0xc   : > { %p1573_p4 = scmp.ne.s32.totalorder (!%p447_p2), %s1919_s26, 0 }
  0x10   : > { %s1925_s27 = scalar_select %p513_p3, %s1919_s26, 1 }
  0x12   : > { %s1607_s28 = sshll.u32 %s1925_s27, 6  ;;  %s1608_s29 = sshll.u32 %s1925_s27, 5 }
  0x13   : > { %s1932_s15 = scalar_lea.vmem %s2243_s1, %s1607_s28  ;;  %s1937_s18 = scalar_lea.vmem %s2244_s2, %s1608_s29 }
  0x14   : > { %s525_s21 = scalar_lea.vmem %s2225_s3, %s1925_s27  ;;  %s528_s24 = scalar_lea.vmem %s2226_s4, %s1925_s27 }
  0x15   : > { %s1950_s12 = scalar_lea.vmem %s2227_s5, %s1607_s28  ;;  %s1570_s30 = sshll.u32 %s1925_s27, 1 }
  0x16   : > { %s1956_s16 = scalar_lea.vmem %s2228_s6, %s1570_s30  ;;  %s1610_s29 = sshll.u32 %s1925_s27, 7 }
  0x17   : > { %s1962_s19 = scalar_lea.vmem %s2229_s7, %s1610_s29  ;;  %s545_s23 = scalar_lea.vmem %s2230_s8, %s1925_s27 }
  0x18   : > { %549 = sbr.rel (%p1573_p4) target bundleno = 31 (0x1f), region = 76 }
  0x1d   : > { %v550_v0 = vld [vmem:[%s2222_s0] sm:$0xff]  ;;  %vm552_vm0 = vcmask 261120   ;;  %v551_v1 = vld [vmem:[%s2222_s0 + $0x8] sm:$0xff] }
  0x1e   : > { %553 = vst.msk [vmem:[#allocation2] sm:$0xff] %vm552_vm0, %v550_v0  ;;  %554 = vst.msk [vmem:[#allocation2 + $0x8] sm:$0xff] %vm552_vm0, %v551_v1 }
  0x1f PF: > { %vm580_vm1 = vcmask 261120   ;;  %v611_v8 = vld [vmem:[%s1932_s15 + $0x38] sm:$0xff]  ;;  %v610_v9 = vld [vmem:[%s1932_s15 + $0x30] sm:$0xff]  ;;  %v609_v10 = vld [vmem:[%s1932_s15 + $0x28] sm:$0xff]  ;;  %v1837_v12 = vmov 0.0   ;;  %s1838_s14 = smov 64  }
  0x20   : > { %642 = vmatprep.subr.mxu0 %v611_v8  ;;  %v608_v11 = vld [vmem:[%s1932_s15 + $0x20] sm:$0xff]  ;;  %682 = vmatprep.mubr.f32.mxu0 %v1837_v12  ;;  %v607_v13 = vld [vmem:[%s1932_s15 + $0x18] sm:$0xff]  ;;  %v606_v14 = vld [vmem:[%s1932_s15 + $0x10] sm:$0xff]  ;;  %s1839_s2 = smov 96   ;;  %s2245_s17 = sld [smem:[#allocation8_spill]]  ;;  %vm864_vm2 = vcmask 130048  }
  0x21   : > { %643 = vmatpush1.msra.mxu0 %v610_v9  ;;  %v605_v15 = vld [vmem:[%s1932_s15 + $0x8] sm:$0xff]  ;;  %v604_v16 = vld [vmem:[%s1932_s15] sm:$0xff]  ;;  %v2038_v53 = vld [vmem:[%s2233_s11 + $0x10] sm:$0xff]  ;;  %p1737_p5 = scmp.eq.s32.totalorder %s1919_s26, 1 }
  0x22   : > { %644 = vmatprep.subr.mxu0 %v609_v10  ;;  %v560_v17 = vld [vmem:[%s2232_s10 + $0x8] sm:$0xff]  ;;  %v559_v18 = vld [vmem:[%s2232_s10] sm:$0xff]  ;;  %v2046_v56 = vld [vmem:[%s2233_s11 + $0x18] sm:$0xff] }
  0x23   : > { %645 = vmatpush1.msra.mxu0 %v608_v11  ;;  %701 = vrot.lane.b32.xlu1 %v560_v17, %s1838_s14  ;;  %v1574_v26 = vld [vmem:[%s525_s21] ss:$0 sm:$0xff]  ;;  %v558_v42 = vld [vmem:[%s2231_s9 + $0x8] sm:$0xff]  ;;  %v2066_v61 = vld [vmem:[%s2233_s11 + $0x30] sm:$0xff] }
  0x24   : > { %646 = vmatprep.subr.mxu0 %v607_v13  ;;  %v557_v40 = vld [vmem:[%s2231_s9] sm:$0xff]  ;;  %v2032_v52 = vld [vmem:[%s2233_s11 + $0x8] sm:$0xff]  ;;  %v2074_v0 = vld [vmem:[%s2233_s11 + $0x38] sm:$0xff] }
  0x25   : > { %v1975_v2 = vld [vmem:[#allocation2] sm:$0xff]  ;;  %v1977_v3 = vld [vmem:[#allocation2 + $0x8] sm:$0xff]  ;;  %647 = vmatpush1.msra.mxu0 %v606_v14 }
  0x26   : > { %v578_v4 = vmul.f32 %v1975_v2, %v1975_v2  ;;  %v579_v5 = vmul.f32 %v1977_v3, %v1977_v3  ;;  %648 = vmatprep.subr.mxu0 %v605_v15  ;;  %v2023_v44 = vld [vmem:[%s2233_s11] sm:$0xff]  ;;  %v2060_v60 = vld [vmem:[%s2233_s11 + $0x28] sm:$0xff]  ;;  %v571_v13 = vld [vmem:[%s2245_s17 + $0x10] sm:$0xff] }
  0x27   : > { %649 = vmatpush1.msra.mxu0 %v604_v16  ;;  %699 = vrot.lane.b32.xlu1 %v559_v18, %s1838_s14  ;;  %v2052_v57 = vld [vmem:[%s2233_s11 + $0x20] sm:$0xff]  ;;  %v572_v15 = vld [vmem:[%s2245_s17 + $0x18] sm:$0xff] }
  0x28   : > { %v581_v6 = vsel %vm580_vm1, %v578_v4, 0.0  ;;  %v584_v7 = vsel %vm580_vm1, %v579_v5, 0.0  ;;  %v570_v4 = vld [vmem:[%s2245_s17 + $0x8] sm:$0xff] }
  0x29   : > { %582 = vadd.xlane.f32.xlu0 %v581_v6  ;;  %v569_v6 = vld [vmem:[%s2245_s17] sm:$0xff] }
  0x2d   : > { %585 = vadd.xlane.f32.xlu0 %v584_v7 }
  0x95   : > { %v702_v32 = vpop.permute.xlu1 %701 }
  0x99   : > { %v700_v33 = vpop.permute.xlu1 %699 }
  0xb2   : > { %v583_v19 = vpop.xlane.xlu0 %582 }
  0xb3   : > { %v588_v20 = vmul.f32 0.03125, %v583_v19  ;;  %v573_v19 = vld [vmem:[%s2245_s17 + $0x20] sm:$0xff] }
  0xb5   : > { %v590_v21 = vadd.f32 1e-05, %v588_v20 }
  0xb6   : > { %v586_v22 = vpop.xlane.xlu0 %585 }
  0xb7   : > { %1753 = vrsqrt.f32 %v590_v21  ;;  %v589_v23 = vmul.f32 0.03125, %v586_v22  ;;  %v574_v22 = vld [vmem:[%s2245_s17 + $0x28] sm:$0xff] }
  0xb9   : > { %v591_v24 = vadd.f32 1e-05, %v589_v23 }
  0xbb   : > { %1755 = vrsqrt.f32 %v591_v24 }
  0xc4   : > { %v1754_v25 = vpop.eup %1753 }
  0xc5   : > { %v594_v27 = vmul.f32 %v1754_v25, %v1975_v2 }
  0xc7   : > { %v602_v28 = vmul.f32 %v1574_v26, %v594_v27 }
  0xc8   : > { %v1756_v29 = vpop.eup %1755 }
  0xc9   : > { %1575 = vmatmul.mubr.msk.f32.vlgmr.msra.gmra.mxu0 %vm580_vm1, %v602_v28  ;;  %v595_v30 = vmul.f32 %v1756_v29, %v1977_v3 }
  0xca   : > { %688 = vmatprep.mubr.f32.mxu0 %v1837_v12 }
  0xcb   : > { %v603_v31 = vmul.f32 %v1574_v26, %v595_v30  ;;  %v575_v26 = vld [vmem:[%s2245_s17 + $0x30] sm:$0xff]  ;;  %v576_v30 = vld [vmem:[%s2245_s17 + $0x38] sm:$0xff] }
  0xcd   : > { %1576 = vmatmul.mubr.msk.f32.gmra.mxu0 %vm580_vm1, %v603_v31 }
 0x189   : > { %v684_v34 = vpop.f32.mrf.mxu0 }
 0x18a   : > { %v705_v35 = vmul.f32 %v700_v33, %v684_v34  ;;  %v695_v41 = vmul.f32 %v684_v34, %v557_v40 }
 0x18b   : > { %v686_v36 = vpop.f32.mrf.mxu0 }
 0x18c   : > { %709 = vrot.lane.b32.xlu1 %v705_v35, %s1838_s14 }
 0x18d   : > { %v690_v37 = vpop.f32.mrf.mxu0 }
 0x18e   : > { %v706_v38 = vmul.f32 %v702_v32, %v690_v37  ;;  %v696_v46 = vmul.f32 %v690_v37, %v558_v42 }
 0x18f   : > { %v692_v39 = vpop.f32.mrf.mxu0 }
 0x190   : > { %711 = vrot.lane.b32.xlu0 %v706_v38, %s1838_s14  ;;  %1671 = vmatprep.subr.mxu0 %v692_v39 }
 0x191   : > { %1672 = vmatpush3.msra.mxu0 %v692_v39 }
 0x192   : > { %1673 = vmatprep.subr.mxu0 %v686_v36 }
 0x193   : > { %1674 = vmatpush3.msra.mxu0 %v686_v36 }
 0x1fe   : > { %v710_v43 = vpop.permute.xlu1 %709 }
 0x1ff   : > { %v715_v45 = vadd.f32 %v710_v43, %v695_v41 }
 0x201   : > { %v717_v47 = vmul.f32 %v715_v45, %v2023_v44  ;;  %v718_v54 = vmul.f32 %v715_v45, %v2032_v52  ;;  %v719_v55 = vmul.f32 %v715_v45, %v2038_v53  ;;  %v720_v58 = vmul.f32 %v715_v45, %v2046_v56 }
 0x202   : > { %v712_v48 = vpop.permute.xlu0 %711 }
 0x203   : > { %v716_v49 = vadd.f32 %v712_v48, %v696_v46  ;;  %1659 = vmatprep.mubr.msk.f32.mxu1 %vm580_vm1, %v717_v47 }
 0x205   : > { %729 = vrot.lane.b32.xlu1 %v716_v49, %s1839_s2  ;;  %v721_v59 = vmul.f32 %v716_v49, %v2052_v57  ;;  %v722_v62 = vmul.f32 %v716_v49, %v2060_v60  ;;  %v723_v63 = vmul.f32 %v716_v49, %v2066_v61  ;;  %v724_v1 = vmul.f32 %v716_v49, %v2074_v0 }
 0x209   : > { %727 = vrot.lane.b32.xlu1 %v715_v45, %s1839_s2 }
 0x277   : > { %v730_v50 = vpop.permute.xlu1 %729 }
 0x278   : > { %1655 = vmatprep.subr.msk.mxu1 %vm580_vm1, %v730_v50 }
 0x279   : > { %1656 = vmatpush3.xpose.msk.msra.mxu1 %vm580_vm1, %v730_v50 }
 0x27b   : > { %v728_v51 = vpop.permute.xlu1 %727 }
 0x27c   : > { %1657 = vmatprep.subr.msk.mxu1 %vm580_vm1, %v728_v51 }
 0x27d   : > { %1658 = vmatpush3.xpose.msk.msra.mxu1 %vm580_vm1, %v728_v51 }
 0x280   : > { %1660 = vmatmul.mubr.msk.f32.vlgmr.msra.gmra.mxu1 %vm580_vm1, %v718_v54 }
 0x281   : > { %1662 = vmatprep.mubr.msk.f32.mxu1 %vm580_vm1, %v719_v55 }
 0x284   : > { %1663 = vmatmul.mubr.msk.f32.gmra.mxu1 %vm580_vm1, %v720_v58 }
 0x285   : > { %1665 = vmatprep.mubr.msk.f32.mxu1 %vm580_vm1, %v721_v59 }
 0x288   : > { %1666 = vmatmul.mubr.msk.f32.gmra.mxu1 %vm580_vm1, %v722_v62 }
 0x289   : > { %1668 = vmatprep.mubr.msk.f32.mxu1 %vm580_vm1, %v723_v63 }
 0x28c   : > { %1669 = vmatmul.mubr.msk.f32.gmra.mxu1 %vm580_vm1, %v724_v1 }
 0x340   : > { %v1661_v5 = vpop.f32.mrf.mxu1 }
 0x341   : > { %v831_v7 = vadd.f32 %v1661_v5, %v570_v4 }
 0x342   : > { %v825_v8 = vpop.f32.mrf.mxu1 }
 0x343   : > { %v826_v9 = vadd.f32 %v825_v8, %v569_v6  ;;  %v868_v10 = vsel %vm864_vm2, %v831_v7, -inf }
 0x344   : > { %869 = vmax.xlane.f32.xlu0 %v868_v10  ;;  %v1664_v11 = vpop.f32.mrf.mxu1 }
 0x345   : > { %v865_v14 = vsel %vm864_vm2, %v826_v9, -inf  ;;  %v841_v20 = vadd.f32 %v1664_v11, %v572_v15 }
 0x346   : > { %v835_v16 = vpop.f32.mrf.mxu1  ;;  %866 = vmax.xlane.f32.xlu1 %v865_v14 }
 0x347   : > { %v836_v17 = vadd.f32 %v835_v16, %v571_v13  ;;  %v874_v28 = vsel %vm864_vm2, %v841_v20, -inf }
 0x348   : > { %v1667_v18 = vpop.f32.mrf.mxu1 }
 0x349   : > { %v871_v21 = vsel %vm864_vm2, %v836_v17, -inf  ;;  %v851_v27 = vadd.f32 %v1667_v18, %v574_v22 }
 0x34a   : > { %872 = vmax.xlane.f32.xlu1 %v871_v21  ;;  %v845_v23 = vpop.f32.mrf.mxu1 }
 0x34b   : > { %v846_v24 = vadd.f32 %v845_v23, %v573_v19  ;;  %v880_v34 = vsel %vm864_vm2, %v851_v27, -inf }
 0x34c   : > { %v1670_v25 = vpop.f32.mrf.mxu1 }
 0x34d   : > { %v877_v29 = vsel %vm864_vm2, %v846_v24, -inf  ;;  %v861_v33 = vadd.f32 %v1670_v25, %v576_v30 }
 0x34e   : > { %875 = vmax.xlane.f32.xlu1 %v874_v28  ;;  %v855_v31 = vpop.f32.mrf.mxu1  ;;  %878 = vmax.xlane.f32.xlu0 %v877_v29 }
 0x34f   : > { %v856_v32 = vadd.f32 %v855_v31, %v575_v26  ;;  %v886_v36 = vsel %vm864_vm2, %v861_v33, -inf }
 0x351   : > { %v883_v35 = vsel %vm864_vm2, %v856_v32, -inf }
 0x352   : > { %881 = vmax.xlane.f32.xlu1 %v880_v34  ;;  %884 = vmax.xlane.f32.xlu0 %v883_v35 }
 0x356   : > { %887 = vmax.xlane.f32.xlu1 %v886_v36 }
 0x3cd   : > { %v870_v37 = vpop.xlane.xlu0 %869 }
 0x3ce   : > { %v890_v38 = vsub.f32 %v831_v7, %v870_v37 }
 0x3cf   : > { %v867_v39 = vpop.xlane.xlu1 %866 }
 0x3d0   : > { %v899_v40 = vmul.f32 1.442695, %v890_v38  ;;  %v889_v41 = vsub.f32 %v826_v9, %v867_v39 }
 0x3d2   : > { %1757 = vpow2.f32 %v899_v40  ;;  %v897_v42 = vmul.f32 1.442695, %v889_v41 }
 0x3d3   : > { %v873_v43 = vpop.xlane.xlu1 %872 }
 0x3d4   : > { %1759 = vpow2.f32 %v897_v42  ;;  %v891_v45 = vsub.f32 %v836_v17, %v873_v43 }
 0x3d6   : > { %v901_v46 = vmul.f32 1.442695, %v891_v45 }
 0x3d7   : > { %v876_v47 = vpop.xlane.xlu1 %875  ;;  %v879_v48 = vpop.xlane.xlu0 %878 }
 0x3d8   : > { %1761 = vpow2.f32 %v901_v46  ;;  %v892_v49 = vsub.f32 %v841_v20, %v876_v47  ;;  %v893_v50 = vsub.f32 %v846_v24, %v879_v48 }
 0x3da   : > { %v903_v51 = vmul.f32 1.442695, %v892_v49  ;;  %v905_v54 = vmul.f32 1.442695, %v893_v50  ;;  %v1107_v49 = vld [vmem:[%s1937_s18 + $0x18] sm:$0xff]  ;;  %v1106_v50 = vld [vmem:[%s1937_s18 + $0x10] sm:$0xff] }
 0x3db   : > { %v882_v55 = vpop.xlane.xlu1 %881  ;;  %v885_v58 = vpop.xlane.xlu0 %884  ;;  %1687 = vmatprep.subr.mxu0 %v1107_v49 }
 0x3dc   : > { %1763 = vpow2.f32 %v903_v51  ;;  %v894_v59 = vsub.f32 %v851_v27, %v882_v55  ;;  %v895_v62 = vsub.f32 %v856_v32, %v885_v58  ;;  %v1105_v51 = vld [vmem:[%s1937_s18 + $0x8] sm:$0xff] }
 0x3dd   : > { %1765 = vpow2.f32 %v905_v54  ;;  %v1104_v54 = vld [vmem:[%s1937_s18] sm:$0xff] }
 0x3de   : > { %v907_v63 = vmul.f32 1.442695, %v894_v59  ;;  %v909_v1 = vmul.f32 1.442695, %v895_v62 }
 0x3df   : > { %v1758_v4 = vpop.eup %1757  ;;  %v888_v5 = vpop.xlane.xlu1 %887 }
 0x3e0   : > { %1767 = vpow2.f32 %v907_v63  ;;  %v896_v6 = vsub.f32 %v861_v33, %v888_v5  ;;  %v916_v7 = vsel %vm864_vm2, %v1758_v4, 0.0 }
 0x3e1   : > { %v1760_v8 = vpop.eup %1759  ;;  %1769 = vpow2.f32 %v909_v1  ;;  %917 = vadd.xlane.f32.xlu1 %v916_v7 }
 0x3e2   : > { %v911_v9 = vmul.f32 1.442695, %v896_v6  ;;  %v913_v10 = vsel %vm864_vm2, %v1760_v8, 0.0 }
 0x3e3   : > { %914 = vadd.xlane.f32.xlu0 %v913_v10 }
 0x3e4   : > { %1771 = vpow2.f32 %v911_v9 }
 0x3e5   : > { %v1762_v11 = vpop.eup %1761 }
 0x3e6   : > { %v919_v13 = vsel %vm864_vm2, %v1762_v11, 0.0 }
 0x3e7   : > { %920 = vadd.xlane.f32.xlu0 %v919_v13 }
 0x3e9   : > { %v1764_v14 = vpop.eup %1763 }
 0x3ea   : > { %v1766_v15 = vpop.eup %1765  ;;  %v922_v16 = vsel %vm864_vm2, %v1764_v14, 0.0 }
 0x3eb   : > { %923 = vadd.xlane.f32.xlu1 %v922_v16  ;;  %v925_v17 = vsel %vm864_vm2, %v1766_v15, 0.0 }
 0x3ec   : > { %926 = vadd.xlane.f32.xlu0 %v925_v17 }
 0x3ed   : > { %v1768_v18 = vpop.eup %1767 }
 0x3ee   : > { %v1770_v19 = vpop.eup %1769  ;;  %v928_v20 = vsel %vm864_vm2, %v1768_v18, 0.0 }
 0x3ef   : > { %929 = vadd.xlane.f32.xlu1 %v928_v20  ;;  %v931_v21 = vsel %vm864_vm2, %v1770_v19, 0.0 }
 0x3f0   : > { %932 = vadd.xlane.f32.xlu0 %v931_v21 }
 0x3f1   : > { %v1772_v22 = vpop.eup %1771 }
 0x3f2   : > { %v934_v23 = vsel %vm864_vm2, %v1772_v22, 0.0 }
 0x3f3   : > { %935 = vadd.xlane.f32.xlu1 %v934_v23 }
 0x46a   : > { %v918_v24 = vpop.xlane.xlu1 %917 }
 0x46b   : > { %1773 = vrcp.f32 %v918_v24 }
 0x46c   : > { %v915_v25 = vpop.xlane.xlu0 %914 }
 0x46d   : > { %1775 = vrcp.f32 %v915_v25 }
 0x470   : > { %v921_v26 = vpop.xlane.xlu0 %920 }
 0x471   : > { %1777 = vrcp.f32 %v921_v26 }
 0x474   : > { %v924_v27 = vpop.xlane.xlu1 %923 }
 0x475   : > { %1779 = vrcp.f32 %v924_v27  ;;  %v927_v28 = vpop.xlane.xlu0 %926 }
 0x476   : > { %1781 = vrcp.f32 %v927_v28 }
 0x478   : > { %v930_v29 = vpop.xlane.xlu1 %929  ;;  %v1774_v30 = vpop.eup %1773 }
 0x479   : > { %1783 = vrcp.f32 %v930_v29  ;;  %v933_v31 = vpop.xlane.xlu0 %932  ;;  %v946_v34 = vmul.f32 %v1774_v30, %v1758_v4  ;;  %v1222_v29 = vld [vmem:[%s1950_s12 + $0x30] sm:$0xff]  ;;  %v1221_v30 = vld [vmem:[%s1950_s12 + $0x28] sm:$0xff] }
 0x47a   : > { %v1776_v32 = vpop.eup %1775  ;;  %1785 = vrcp.f32 %v933_v31  ;;  %v1219_v31 = vld [vmem:[%s1950_s12 + $0x18] sm:$0xff] }
 0x47b   : > { %v945_v33 = vmul.f32 %v1776_v32, %v1760_v8  ;;  %v1218_v32 = vld [vmem:[%s1950_s12 + $0x10] sm:$0xff] }
 0x47c   : > { %v936_v35 = vpop.xlane.xlu1 %935 }
 0x47d   : > { %1787 = vrcp.f32 %v936_v35  ;;  %1675 = vmatprep.mubr.msk.f32.mxu0 %vm864_vm2, %v945_v33  ;;  %v1217_v33 = vld [vmem:[%s1950_s12 + $0x8] sm:$0xff] }
 0x47e   : > { %v1778_v36 = vpop.eup %1777  ;;  %1676 = vmatmul.mubr.msk.f32.vlgmr.msra.gmra.mxu0 %vm864_vm2, %v946_v34  ;;  %v1216_v34 = vld [vmem:[%s1950_s12] sm:$0xff] }
 0x47f   : > { %v947_v37 = vmul.f32 %v1778_v36, %v1762_v11  ;;  %1688 = vmatpush3.msra.mxu0 %v1107_v49  ;;  %v1350_v49 = vld [vmem:[%s1962_s19 + $0x78] sm:$0xff] }
 0x480   : > { %1689 = vmatprep.subr.mxu0 %v1106_v50  ;;  %1698 = vmatprep.subr.mxu1 %v1350_v49 }
 0x481   : > { %1678 = vmatprep.mubr.msk.f32.mxu0 %vm864_vm2, %v947_v37  ;;  %1690 = vmatpush3.msra.mxu0 %v1106_v50  ;;  %v1349_v50 = vld [vmem:[%s1962_s19 + $0x70] sm:$0xff] }
 0x482   : > { %v1780_v38 = vpop.eup %1779  ;;  %1691 = vmatprep.subr.mxu0 %v1105_v51  ;;  %1699 = vmatpush3.msra.mxu1 %v1350_v49 }
 0x483   : > { %v1782_v39 = vpop.eup %1781  ;;  %v948_v40 = vmul.f32 %v1780_v38, %v1764_v14  ;;  %1692 = vmatpush3.msra.mxu0 %v1105_v51  ;;  %1700 = vmatprep.subr.mxu1 %v1349_v50  ;;  %v1348_v51 = vld [vmem:[%s1962_s19 + $0x68] sm:$0xff] }
 0x484   : > { %v949_v41 = vmul.f32 %v1782_v39, %v1766_v15  ;;  %1693 = vmatprep.subr.mxu0 %v1104_v54  ;;  %1701 = vmatpush3.msra.mxu1 %v1349_v50 }
 0x485   : > { %1679 = vmatmul.mubr.msk.f32.gmra.mxu0 %vm864_vm2, %v948_v40  ;;  %1702 = vmatprep.subr.mxu1 %v1348_v51 }
 0x486   : > { %v1784_v42 = vpop.eup %1783  ;;  %1681 = vmatprep.mubr.msk.f32.mxu0 %vm864_vm2, %v949_v41  ;;  %1694 = vmatpush3.msra.mxu0 %v1104_v54  ;;  %v1347_v54 = vld [vmem:[%s1962_s19 + $0x60] sm:$0xff] }
 0x487   : > { %v1786_v43 = vpop.eup %1785  ;;  %v950_v45 = vmul.f32 %v1784_v42, %v1768_v18  ;;  %1703 = vmatpush3.msra.mxu1 %v1348_v51 }
 0x488   : > { %v951_v46 = vmul.f32 %v1786_v43, %v1770_v19  ;;  %1704 = vmatprep.subr.mxu1 %v1347_v54 }
 0x489   : > { %1682 = vmatmul.mubr.msk.f32.gmra.mxu0 %vm864_vm2, %v950_v45  ;;  %v1597_v45 = vld [vmem:[%s528_s24] ss:$0 sm:$0xff]  ;;  %1705 = vmatpush3.msra.mxu1 %v1347_v54 }
 0x48a   : > { %v1788_v47 = vpop.eup %1787  ;;  %1684 = vmatprep.mubr.msk.f32.mxu0 %vm864_vm2, %v951_v46 }
 0x48b   : > { %v952_v48 = vmul.f32 %v1788_v47, %v1772_v22 }
 0x48d   : > { %1685 = vmatmul.mubr.msk.f32.gmra.mxu0 %vm864_vm2, %v952_v48 }
 0x53e   : > { %v1677_v55 = vpop.f32.mrf.mxu0 }
 0x53f   : > { %v1083_v62 = vmul.f32 %v1677_v55, %v2032_v52  ;;  %v1345_v55 = vld [vmem:[%s1962_s19 + $0x50] sm:$0xff] }
 0x540   : > { %v1043_v58 = vpop.f32.mrf.mxu0 }
 0x541   : > { %v1082_v59 = vmul.f32 %v1043_v58, %v2023_v44  ;;  %v1091_v5 = vsel %vm580_vm1, %v1083_v62, 0.0  ;;  %v1344_v58 = vld [vmem:[%s1962_s19 + $0x48] sm:$0xff]  ;;  %v1342_v62 = vld [vmem:[%s1962_s19 + $0x38] sm:$0xff] }
 0x543   : > { %v1090_v1 = vsel %vm580_vm1, %v1082_v59, 0.0  ;;  %v1343_v59 = vld [vmem:[%s1962_s19 + $0x40] sm:$0xff] }
 0x544   : > { %v1092_v8 = vadd.f32 %v1091_v5, %v1090_v1  ;;  %v1340_v1 = vld [vmem:[%s1962_s19 + $0x28] sm:$0xff]  ;;  %v1338_v5 = vld [vmem:[%s1962_s19 + $0x18] sm:$0xff] }
 0x545   : > { %v1680_v63 = vpop.f32.mrf.mxu0 }
 0x546   : > { %v1085_v6 = vmul.f32 %v1680_v63, %v2046_v56  ;;  %v1341_v63 = vld [vmem:[%s1962_s19 + $0x30] sm:$0xff] }
 0x547   : > { %v1053_v4 = vpop.f32.mrf.mxu0 }
 0x548   : > { %v1084_v7 = vmul.f32 %v1053_v4, %v2038_v53  ;;  %v1095_v44 = vsel %vm580_vm1, %v1085_v6, 0.0  ;;  %v1339_v4 = vld [vmem:[%s1962_s19 + $0x20] sm:$0xff]  ;;  %v1337_v6 = vld [vmem:[%s1962_s19 + $0x10] sm:$0xff] }
 0x549   : > { %v1683_v9 = vpop.f32.mrf.mxu0 }
 0x54a   : > { %v1093_v10 = vsel %vm580_vm1, %v1084_v7, 0.0  ;;  %v1087_v52 = vmul.f32 %v1683_v9, %v2060_v60  ;;  %v1336_v7 = vld [vmem:[%s1962_s19 + $0x8] sm:$0xff]  ;;  %v1226_v9 = vlaneseq }
 0x54b   : > { %v1094_v11 = vadd.f32 %v1093_v10, %v1092_v8  ;;  %v1063_v13 = vpop.f32.mrf.mxu0  ;;  %v1335_v8 = vld [vmem:[%s1962_s19] sm:$0xff] }
 0x54c   : > { %v1086_v14 = vmul.f32 %v1063_v13, %v2052_v57  ;;  %v1098_v53 = vsel %vm580_vm1, %v1087_v52, 0.0  ;;  %v1227_v10 = vshrl.u32 %v1226_v9, 7  ;;  %v1224_v13 = vld [vmem:[%s1956_s16] sm:$0x3] }
 0x54d   : > { %v1096_v15 = vadd.f32 %v1095_v44, %v1094_v11  ;;  %v1686_v16 = vpop.f32.mrf.mxu0 }
 0x54e   : > { %v1097_v17 = vsel %vm580_vm1, %v1086_v14, 0.0  ;;  %v1089_v56 = vmul.f32 %v1686_v16, %v2074_v0  ;;  %v1228_v11 = vsub.s32 0, %v1227_v10 }
 0x54f   : > { %v1073_v18 = vpop.f32.mrf.mxu0  ;;  %1695 = vmatprep.mubr.msk.f32.mxu0 %vm580_vm1, %v1096_v15  ;;  %v1099_v20 = vadd.f32 %v1098_v53, %v1097_v17 }
 0x550   : > { %v1088_v19 = vmul.f32 %v1073_v18, %v2066_v61  ;;  %v1102_v57 = vsel %vm580_vm1, %v1089_v56, 0.0  ;;  %v1229_v44 = vrot.slane %v1224_v13, %v1228_v11 }
 0x552   : > { %v1100_v21 = vsel %vm580_vm1, %v1088_v19, 0.0 }
 0x553   : > { %v1101_v60 = vadd.f32 %v1100_v21, %v1099_v20 }
 0x555   : > { %v1103_v22 = vadd.f32 %v1102_v57, %v1101_v60  ;;  %v1232_v60 = vsub.s32 1, %v1227_v10 }
 0x557   : > { %1696 = vmatmul.mubr.msk.f32.vlgmr.msra.gmra.mxu0 %vm580_vm1, %v1103_v22  ;;  %v1233_v57 = vrot.slane %v1224_v13, %v1232_v60 }
 0x558   : > { %1306 = vmatprep.mubr.f32.mxu0 %v1837_v12 }
 0x617   : > { %v1697_v23 = vpop.f32.mrf.mxu0 }
 0x618   : > { %v2152_v0 = vadd.f32 %v1697_v23, %v1977_v3  ;;  %v1223_v3 = vld [vmem:[%s1950_s12 + $0x38] sm:$0xff] }
 0x619   : > { %v1180_v61 = vpop.f32.mrf.mxu0  ;;  %1266 = vmatprep.subr.mxu0 %v1223_v3 }
 0x61a   : > { %v2155_v24 = vadd.f32 %v1180_v61, %v1975_v2  ;;  %v1193_v25 = vmul.f32 %v2152_v0, %v2152_v0  ;;  %v1220_v2 = vld [vmem:[%s1950_s12 + $0x20] sm:$0xff]  ;;  %1267 = vmatpush1.msra.mxu0 %v1222_v29 }
 0x61b   : > { %1268 = vmatprep.subr.mxu0 %v1221_v30  ;;  %v1602_v30 = vld [vmem:[%s545_s23] ss:$0 sm:$0xff] }
 0x61c   : > { %v1197_v26 = vsel %vm580_vm1, %v1193_v25, 0.0  ;;  %v1192_v27 = vmul.f32 %v2155_v24, %v2155_v24  ;;  %1269 = vmatpush1.msra.mxu0 %v1220_v2 }
 0x61d   : > { %1198 = vadd.xlane.f32.xlu1 %v1197_v26  ;;  %1270 = vmatprep.subr.mxu0 %v1219_v31 }
 0x61e   : > { %v1194_v28 = vsel %vm580_vm1, %v1192_v27, 0.0  ;;  %1271 = vmatpush1.msra.mxu0 %v1218_v32 }
 0x61f   : > { %1195 = vadd.xlane.f32.xlu0 %v1194_v28  ;;  %1272 = vmatprep.subr.mxu0 %v1217_v33 }
 0x620   : > { %1273 = vmatpush1.msra.mxu0 %v1216_v34 }
 0x6a6   : > { %v1199_v35 = vpop.xlane.xlu1 %1198 }
 0x6a7   : > { %v1201_v36 = vmul.f32 0.03125, %v1199_v35 }
 0x6a8   : > { %v1196_v37 = vpop.xlane.xlu0 %1195 }
 0x6a9   : > { %v1203_v38 = vadd.f32 1e-05, %v1201_v36  ;;  %v1200_v39 = vmul.f32 0.03125, %v1196_v37 }
 0x6ab   : > { %v1202_v40 = vadd.f32 1e-05, %v1200_v39  ;;  %1789 = vrsqrt.f32 %v1203_v38 }
 0x6ad   : > { %1791 = vrsqrt.f32 %v1202_v40 }
 0x6b8   : > { %v1790_v41 = vpop.eup %1789 }
 0x6b9   : > { %v1207_v47 = vmul.f32 %v1790_v41, %v2152_v0 }
 0x6ba   : > { %v1792_v42 = vpop.eup %1791 }
 0x6bb   : > { %v1206_v43 = vmul.f32 %v1792_v42, %v2155_v24  ;;  %v1215_v48 = vmul.f32 %v1597_v45, %v1207_v47 }
 0x6bd   : > { %v1214_v46 = vmul.f32 %v1597_v45, %v1206_v43 }
 0x6bf   : > { %1598 = vmatmul.mubr.msk.f32.vlgmr.msra.gmra.mxu0 %vm580_vm1, %v1214_v46 }
 0x6c0   : > { %1312 = vmatprep.mubr.f32.mxu0 %v1837_v12  ;;  %v1346_v12 = vld [vmem:[%s1962_s19 + $0x58] sm:$0xff]  ;;  %s1840_s19 = smov [#allocation2]  }
 0x6c1   : > { %1706 = vmatprep.subr.mxu1 %v1346_v12  ;;  %s1443_s21 = sshll.u32 %s1840_s19, 4  ;;  %s1444_s21 = int_to_ptr.vmem [resolvable:$true] %s1443_s21 }
 0x6c2   : > { %1707 = vmatpush3.msra.mxu1 %v1346_v12  ;;  %s1801_s22 = scalar_lea.vmem %s1444_s21, 256  ;;  %p1808_p9 = scmp.lt.s32.totalorder %s1444_s21, %s1444_s21 }
 0x6c3   : > { %1599 = vmatmul.mubr.msk.f32.gmra.mxu0 %vm580_vm1, %v1215_v48  ;;  %1708 = vmatprep.subr.mxu1 %v1345_v55  ;;  %p1802_p6 = scmp.ne.s32.totalorder %s1444_s21, %s1801_s22  ;;  %p1809_p10 = scmp.lt.s32.totalorder %s1801_s22, %s1801_s22 }
 0x6c4   : > { %1709 = vmatpush3.msra.mxu1 %v1345_v55 }
 0x6c5   : > { %1710 = vmatprep.subr.mxu1 %v1344_v58  ;;  %p1803_p7 = pnand %p1802_p6, %p1737_p5  ;;  %p1810_p11 = por %p1809_p10, %p1808_p9 }
 0x6c6   : > { %1711 = vmatpush3.msra.mxu1 %v1344_v58 }
 0x6c7   : > { %1712 = vmatprep.subr.mxu1 %v1343_v59  ;;  %p1804_p8 = pneg %p1803_p7 }
 0x6c8   : > { %1713 = vmatpush3.msra.mxu1 %v1343_v59 }
 0x6c9   : > { %1714 = vmatprep.subr.mxu1 %v1342_v62  ;;  %p1811_p12 = pnand %p1810_p11, %p1804_p8 }
 0x6ca   : > { %1715 = vmatpush3.msra.mxu1 %v1342_v62 }
 0x6cb   : > { %1716 = vmatprep.subr.mxu1 %v1341_v63 }
 0x6cc   : > { %1717 = vmatpush3.msra.mxu1 %v1341_v63 }
 0x6cd   : > { %1718 = vmatprep.subr.mxu1 %v1340_v1 }
 0x6ce   : > { %1719 = vmatpush3.msra.mxu1 %v1340_v1 }
 0x6cf   : > { %1720 = vmatprep.subr.mxu1 %v1339_v4 }
 0x6d0   : > { %1721 = vmatpush3.msra.mxu1 %v1339_v4 }
 0x6d1   : > { %1722 = vmatprep.subr.mxu1 %v1338_v5 }
 0x6d2   : > { %1723 = vmatpush3.msra.mxu1 %v1338_v5 }
 0x6d3   : > { %1724 = vmatprep.subr.mxu1 %v1337_v6 }
 0x6d4   : > { %1725 = vmatpush3.msra.mxu1 %v1337_v6 }
 0x6d5   : > { %1726 = vmatprep.subr.mxu1 %v1336_v7 }
 0x6d6   : > { %1727 = vmatpush3.msra.mxu1 %v1336_v7 }
 0x6d7   : > { %1728 = vmatprep.subr.mxu1 %v1335_v8 }
 0x6d8   : > { %1729 = vmatpush3.msra.mxu1 %v1335_v8 }
 0x77f   : > { %v1308_v52 = vpop.f32.mrf.mxu0 }
 0x780   : > { %v1309_v14 = vadd.f32 %v1308_v52, %v1229_v44 }
 0x781   : > { %v1310_v15 = vpop.f32.mrf.mxu0 }
 0x782   : > { %v1600_v16 = vmul.f32 -1.442695, %v1309_v14  ;;  %v1311_v61 = vadd.f32 %v1310_v15, %v1233_v57 }
 0x783   : > { %v1314_v17 = vpop.f32.mrf.mxu0 }
 0x784   : > { %1793 = vpow2.f32 %v1600_v16  ;;  %v1315_v18 = vadd.f32 %v1314_v17, %v1229_v44 }
 0x785   : > { %v1316_v25 = vpop.f32.mrf.mxu0 }
 0x786   : > { %v1601_v53 = vmul.f32 -1.442695, %v1315_v18  ;;  %v1317_v3 = vadd.f32 %v1316_v25, %v1233_v57 }
 0x788   : > { %1795 = vpow2.f32 %v1601_v53 }
 0x791   : > { %v1794_v56 = vpop.eup %1793 }
 0x792   : > { %v1325_v19 = vadd.f32 1.0, %v1794_v56 }
 0x794   : > { %1797 = vrcp.f32 %v1325_v19 }
 0x795   : > { %v1796_v20 = vpop.eup %1795 }
 0x796   : > { %v1326_v21 = vadd.f32 1.0, %v1796_v20 }
 0x798   : > { %1799 = vrcp.f32 %v1326_v21 }
 0x7a1   : > { %v1798_v22 = vpop.eup %1797 }
 0x7a2   : > { %v1331_v23 = vmul.f32 %v1798_v22, %v1309_v14 }
 0x7a4   : > { %v1333_v26 = vmul.f32 %v1331_v23, %v1311_v61 }
 0x7a5   : > { %v1800_v27 = vpop.eup %1799 }
 0x7a6   : > { %v1332_v28 = vmul.f32 %v1800_v27, %v1315_v18  ;;  %1730 = vmatprep.mubr.f32.mxu1 %v1333_v26 }
 0x7a8   : > { %v1334_v29 = vmul.f32 %v1332_v28, %v1317_v3 }
 0x7aa   : > { %1731 = vmatmul.mubr.f32.vlgmr.msra.gmra.mxu1 %v1334_v29 }
 0x86a   : > { %v1732_v2 = vpop.f32.mrf.mxu1 }
 0x86b   : > { %v1430_v31 = vadd.f32 %v1732_v2, %v1602_v30 }
 0x86c   : > { %v1424_v32 = vpop.f32.mrf.mxu1 }
 0x86d   : > { %v1434_v33 = vadd.f32 %v1430_v31, %v2152_v0  ;;  %v1425_v34 = vadd.f32 %v1602_v30, %v1424_v32 }
 0x86f   : > { %1436 = vst.msk [vmem:[#allocation2 + $0x8] sm:$0xff] %vm580_vm1, %v1434_v33  ;;  %v1433_v35 = vadd.f32 %v1425_v34, %v2155_v24 }
 0x871   : > { %1435 = vst.msk [vmem:[#allocation2] sm:$0xff] %vm580_vm1, %v1433_v35 }
 0x872   : > { %1814 = shalt.err (!%p1811_p12)
}
 0x873   : > { %s1841_s27 = smov 128   ;;  %s1842_s23 = smov 8  }
 0x874   : > { %s2246_s1 = sld [smem:[#allocation9_spill]] }
 0x87a   : > { %1734 = dma.vmem_to_hbm [thread:$0]  (%p1737_p5), %s1444_s21, 256, %s2246_s1, [#allocation3], %s1841_s27, %s1841_s27, %s1842_s23  }
 0x87b   : > { %1830 = dma.done.wait (%p1737_p5), [#allocation3], 256  }
 0x87c   : > { %1832 = vsyncadd (%p1737_p5), [#allocation3], 4294967040 }
 0x87d PF: > { %s2247_s28 = sld [smem:[#allocation5_spill]] }
 0x883   : > { %s24_s25 = sadd.s32 1, %s2247_s28  }
 0x884   : > { %p21_p13 = scmp.ge.s32.totalorder %s24_s25, 4  }
 0x886   :  { %23 = sbr.rel (!%p21_p13) target bundleno = 6 (0x6), region = 124 }
 0x88b   :  { %1459 = vsyncpa [#allocation3], 1 }
 0x88c   :  { %1461 = vsyncpa [#allocation3 + $0x1], 1 }

</bundles_post_ra>
